<compile_context>
chip_gen: v7x
topology: tpu7x:2x2x1
jax: 0.10.0
libtpu: 0.0.40
codegen_flags: <defaults>
</compile_context>

<pallas_src>
import jax
import jax.numpy as jnp
from jax.experimental import pallas as pl
from jax.experimental.pallas import tpu as pltpu

CLIP_MEAN = (0.48145466, 0.4578275, 0.40821073)
CLIP_STD = (0.26862954, 0.26130258, 0.27577711)
COS_EPS = 1e-8          # F.cosine_similarity eps (each norm clamped separately)
LANE = 128              # feature dim padded to one full lane register


# ------------------------------ Pallas kernel -------------------------------


def _clip_forward_kernel(p0_ref, p1_ref, t0_ref, t1_ref,
                         w_img_ref, b_img_ref, w_txt_ref, out_ref):
    """Fused image/text encode + 4 cosine similarities for one batch tile.

    p0/p1 : (TB, N, P)   patchified resized images
    t0/t1 : (TB, E)      mean-pooled token embeddings
    w_img : (P, LANE)    folded  diag(1/std) @ Wpatch @ Wproj  (zero padded)
    b_img : (1, LANE)    folded  -(mean/std) @ Wpatch @ Wproj  (zero padded)
    w_txt : (E, LANE)    Wtext (zero padded)
    out   : (TB, LANE)   cols 0..3 = sim_0, sim_1, sim_direction, sim_image
    """
    inv_n = 1.0 / p0_ref.shape[1]
    w_img = w_img_ref[...]
    b_img = b_img_ref[...]
    w_txt = w_txt_ref[...]

    def l2_normalize(f):
        # matches torch `f / f.norm(dim=1, keepdim=True)` (no eps)
        return f * jax.lax.rsqrt(jnp.sum(f * f, axis=-1, keepdims=True))

    def encode_image(p_ref):
        # mean-pool commuted through the linear patch embed (see header).
        pooled = jnp.sum(p_ref[...], axis=1) * inv_n                  # (TB, P)
        feat = jnp.dot(pooled, w_img,
                       preferred_element_type=jnp.float32) + b_img    # (TB, 128)
        return l2_normalize(feat)

    def encode_text(t_ref):
        feat = jnp.dot(t_ref[...], w_txt,
                       preferred_element_type=jnp.float32)            # (TB, 128)
        return l2_normalize(feat)

    def cosine(a, b):
        # F.cosine_similarity semantics: each norm clamped to eps separately.
        inv_na = jax.lax.rsqrt(
            jnp.maximum(jnp.sum(a * a, axis=-1, keepdims=True), COS_EPS * COS_EPS))
        inv_nb = jax.lax.rsqrt(
            jnp.maximum(jnp.sum(b * b, axis=-1, keepdims=True), COS_EPS * COS_EPS))
        return jnp.sum(a * b, axis=-1, keepdims=True) * inv_na * inv_nb  # (TB, 1)

    i0 = encode_image(p0_ref)
    i1 = encode_image(p1_ref)
    t0 = encode_text(t0_ref)
    t1 = encode_text(t1_ref)

    sim_0 = cosine(i0, t0)
    sim_1 = cosine(i1, t1)
    sim_dir = cosine(i1 - i0, t1 - t0)
    sim_img = cosine(i0, i1)

    # Lane-dense output slab: unmasked vst, no width-4 concat through the XLU.
    tb = out_ref.shape[0]
    col = jax.lax.broadcasted_iota(jnp.int32, (tb, LANE), 1)
    out_ref[...] = (sim_0 * (col == 0).astype(jnp.float32)
                    + sim_1 * (col == 1).astype(jnp.float32)
                    + sim_dir * (col == 2).astype(jnp.float32)
                    + sim_img * (col == 3).astype(jnp.float32))


def _pick_tile_b(batch):
    # Largest power-of-two batch tile (multiple of 8) that divides the batch;
    # otherwise a single whole-batch block.  At real image sizes the tile
    # should also be bounded so 2 patch inputs x 2 buffers x TB*N*P*4B fits the
    # scoped VMEM limit (~half the v6e headroom on v7x's 64 MiB VMEM).
    for t in (128, 64, 32, 16, 8):
        if batch % t == 0:
            return t
    return batch


# -------------------------------- the module --------------------------------


class ClipSimilarityPallas:
    """Synthetic-weight re-implementation of ClipSimilarity.forward."""

    _SIZE = {"RN50x4": 288, "RN50x16": 384, "RN50x64": 448,
             "ViT-L/14@336px": 336}

    def __init__(self, name="ViT-L/14@336px", *, size=None, patch=4,
                 embed_dim=64, out_dim=64, vocab=256, ctx_len=8, seed=0):
        assert name in ("RN50", "RN101", "RN50x4", "RN50x16", "RN50x64",
                        "ViT-B/32", "ViT-B/16", "ViT-L/14", "ViT-L/14@336px")
        assert out_dim <= LANE
        self.size = size if size is not None else self._SIZE.get(name, 224)
        self.patch = patch
        self.embed_dim = embed_dim
        self.out_dim = out_dim
        self.ctx_len = ctx_len
        self.vocab = vocab

        patch_dim = 3 * patch * patch
        k = jax.random.PRNGKey(seed)
        k1, k2, k3, k4 = jax.random.split(k, 4)
        # TODO(synk): real CLIP ViT-L/14@336px weights cannot be loaded; use a
        # deterministic random patch-embed + projection encoder instead.
        self.w_patch = (jax.random.normal(k1, (patch_dim, embed_dim), jnp.float32)
                        / jnp.sqrt(patch_dim))
        self.w_proj = (jax.random.normal(k2, (embed_dim, out_dim), jnp.float32)
                       / jnp.sqrt(embed_dim))
        self.text_embedding = jax.random.normal(
            k3, (vocab, embed_dim), jnp.float32) * 0.02
        self.w_text = (jax.random.normal(k4, (embed_dim, out_dim), jnp.float32)
                       / jnp.sqrt(embed_dim))

        p2 = patch * patch
        mean_vec = jnp.repeat(jnp.asarray(CLIP_MEAN, jnp.float32), p2)     # (P,)
        istd_vec = jnp.repeat(1.0 / jnp.asarray(CLIP_STD, jnp.float32), p2)
        self.mean_vec = mean_vec.reshape(1, 1, patch_dim)   # for the reference
        self.istd_vec = istd_vec.reshape(1, 1, patch_dim)

        # ---- algebraic folds (exact for this linear synthetic encoder) ----
        w_img = (istd_vec[:, None] * self.w_patch) @ self.w_proj          # (P, D)
        b_img = -((mean_vec * istd_vec) @ self.w_patch) @ self.w_proj     # (D,)
        pad = LANE - out_dim
        self.w_img_pad = jnp.pad(w_img, ((0, 0), (0, pad)))               # (P, 128)
        self.b_img_pad = jnp.pad(b_img, ((0, pad),)).reshape(1, LANE)     # (1, 128)
        self.w_txt_pad = jnp.pad(self.w_text, ((0, 0), (0, pad)))         # (E, 128)

    # -------- plain-JAX glue --------

    def _patchify(self, x):
        B, C, H, W = x.shape
        p = self.patch
        x = x.reshape(B, C, H // p, p, W // p, p)
        x = x.transpose(0, 2, 4, 1, 3, 5)                  # B, H/p, W/p, C, p, p
        return x.reshape(B, (H // p) * (W // p), C * p * p)

    def _image_patches(self, image):
        B = image.shape[0]
        # TODO(synk): torch F.interpolate bicubic (a=-0.75, align_corners=False)
        # vs jax.image.resize cubic kernel differ slightly at the boundary.
        x = jax.image.resize(image.astype(jnp.float32),
                             (B, 3, self.size, self.size), method="cubic")
        return self._patchify(x)                            # (B, N, P)

    def _text_pooled(self, token_ids):
        # TODO(synk): clip.tokenize (BPE tokenizer) has no Pallas equivalent;
        # the caller supplies integer token ids of shape (B, ctx_len).
        emb = jnp.take(self.text_embedding, token_ids, axis=0)   # (B, L, E)
        return jnp.mean(emb, axis=1)                             # (B, E)

    # -------- forward (single fused pallas_call) --------

    def forward(self, image_0, image_1, text_0, text_1):
        p0 = self._image_patches(image_0)
        p1 = self._image_patches(image_1)
        t0 = self._text_pooled(text_0)
        t1 = self._text_pooled(text_1)

        B, N, P = p0.shape
        E = t0.shape[1]
        tile_b = _pick_tile_b(B)
        pad_b = (-B) % tile_b
        if pad_b:
            p0 = jnp.pad(p0, ((0, pad_b), (0, 0), (0, 0)))
            p1 = jnp.pad(p1, ((0, pad_b), (0, 0), (0, 0)))
            t0 = jnp.pad(t0, ((0, pad_b), (0, 0)))
            t1 = jnp.pad(t1, ((0, pad_b), (0, 0)))
        Bp = B + pad_b

        patch_spec = pl.BlockSpec((tile_b, N, P), lambda i: (i, 0, 0))
        txt_spec = pl.BlockSpec((tile_b, E), lambda i: (i, 0))
        w_img_spec = pl.BlockSpec((P, LANE), lambda i: (0, 0))
        b_img_spec = pl.BlockSpec((1, LANE), lambda i: (0, 0))
        w_txt_spec = pl.BlockSpec((E, LANE), lambda i: (0, 0))
        out_spec = pl.BlockSpec((tile_b, LANE), lambda i: (i, 0))

        sims = pl.pallas_call(
            _clip_forward_kernel,
            out_shape=jax.ShapeDtypeStruct((Bp, LANE), jnp.float32),
            grid=(Bp // tile_b,),
            in_specs=[patch_spec, patch_spec, txt_spec, txt_spec,
                      w_img_spec, b_img_spec, w_txt_spec],
            out_specs=out_spec,
            compiler_params=pltpu.CompilerParams(
                dimension_semantics=("parallel",),
                vmem_limit_bytes=32 * 1024 * 1024),
        )(p0, p1, t0, t1, self.w_img_pad, self.b_img_pad, self.w_txt_pad)

        sims = sims[:B]
        return sims[:, 0], sims[:, 1], sims[:, 2], sims[:, 3]

    # -------- pure-JAX reference (original op order, for verification) --------

    def _ref_forward(self, image_0, image_1, text_0, text_1):
        def enc_img(img):
            B = img.shape[0]
            x = jax.image.resize(img.astype(jnp.float32),
                                 (B, 3, self.size, self.size), method="cubic")
            p = self._patchify(x)
            p = (p - self.mean_vec) * self.istd_vec
            tok = jnp.einsum("bnp,pd->bnd", p, self.w_patch)
            f = jnp.mean(tok, axis=1) @ self.w_proj
            return f / jnp.linalg.norm(f, axis=-1, keepdims=True)

        def enc_txt(tok):
            e = jnp.take(self.text_embedding, tok, axis=0)
            f = jnp.mean(e, axis=1) @ self.w_text
            return f / jnp.linalg.norm(f, axis=-1, keepdims=True)

        def cos(a, b):
            na = jnp.maximum(jnp.linalg.norm(a, axis=-1), COS_EPS)
            nb = jnp.maximum(jnp.linalg.norm(b, axis=-1), COS_EPS)
            return jnp.sum(a * b, -1) / (na * nb)

        i0, i1 = enc_img(image_0), enc_img(image_1)
        t0, t1 = enc_txt(text_0), enc_txt(text_1)
        return cos(i0, t0), cos(i1, t1), cos(i1 - i0, t1 - t0), cos(i0, i1)


# ------------------------------------ main -----------------------------------


if __name__ == "__main__":
    key = jax.random.PRNGKey(0)
    k_img0, k_img1, k_txt0, k_txt1 = jax.random.split(key, 4)

    B, C, H, W = 2, 3, 16, 16
    image_0 = jax.random.uniform(k_img0, (B, C, H, W), jnp.float32)
    image_1 = jax.random.uniform(k_img1, (B, C, H, W), jnp.float32)
    text_0 = jax.random.randint(k_txt0, (B, 8), 0, 256, jnp.int32)
    text_1 = jax.random.randint(k_txt1, (B, 8), 0, 256, jnp.int32)

    model = ClipSimilarityPallas("ViT-L/14@336px", size=32, patch=4,
                                 embed_dim=64, out_dim=64, ctx_len=8, seed=0)

    forward = jax.jit(model.forward)
    out = forward(image_0, image_1, text_0, text_1)
    out = jax.block_until_ready(out)

    ref = model._ref_forward(image_0, image_1, text_0, text_1)
    for got, want in zip(out, ref):
        assert jnp.allclose(got, want, atol=1e-4, rtol=1e-4), (got, want)

    print("KERNEL_OK")
</pallas_src>

<mosaic_0001>
module attributes {stable_mosaic.version = 11 : i64} {
  func.func @_clip_forward_kernel(%arg0: i32, %arg1: memref<2x64x48xf32, #tpu.memory_space<vmem>>, %arg2: memref<2x64x48xf32, #tpu.memory_space<vmem>>, %arg3: memref<2x64xf32, #tpu.memory_space<vmem>>, %arg4: memref<2x64xf32, #tpu.memory_space<vmem>>, %arg5: memref<48x128xf32, #tpu.memory_space<vmem>>, %arg6: memref<1x128xf32, #tpu.memory_space<vmem>>, %arg7: memref<64x128xf32, #tpu.memory_space<vmem>>, %arg8: memref<2x128xf32, #tpu.memory_space<vmem>>) attributes {dimension_semantics = [#tpu.dimension_semantics<parallel>], iteration_bounds = array<i64: 1>, scalar_prefetch = 0 : i64, scratch_operands = 0 : i64, tpu.core_type = #tpu.core_type<tc>, window_params = [{transform_indices = @transform_0, window_bounds = array<i64: 2, 64, 48>}, {transform_indices = @transform_1, window_bounds = array<i64: 2, 64, 48>}, {transform_indices = @transform_2, window_bounds = array<i64: 2, 64>}, {transform_indices = @transform_3, window_bounds = array<i64: 2, 64>}, {pipeline_mode = #tpu.pipeline_mode<synchronous>, transform_indices = @transform_4, window_bounds = array<i64: 48, 128>}, {pipeline_mode = #tpu.pipeline_mode<synchronous>, transform_indices = @transform_5, window_bounds = array<i64: 1, 128>}, {pipeline_mode = #tpu.pipeline_mode<synchronous>, transform_indices = @transform_6, window_bounds = array<i64: 64, 128>}, {transform_indices = @transform_7, window_bounds = array<i64: 2, 128>}]} {
    %c0 = arith.constant 0 : index
    %c0_0 = arith.constant 0 : index
    %0 = vector.load %arg5[%c0, %c0_0] : memref<48x128xf32, #tpu.memory_space<vmem>>, vector<48x128xf32>
    %c0_1 = arith.constant 0 : index
    %c0_2 = arith.constant 0 : index
    %1 = vector.load %arg6[%c0_1, %c0_2] : memref<1x128xf32, #tpu.memory_space<vmem>>, vector<1x128xf32>
    %c0_3 = arith.constant 0 : index
    %c0_4 = arith.constant 0 : index
    %2 = vector.load %arg7[%c0_3, %c0_4] : memref<64x128xf32, #tpu.memory_space<vmem>>, vector<64x128xf32>
    %c0_5 = arith.constant 0 : index
    %c0_6 = arith.constant 0 : index
    %c0_7 = arith.constant 0 : index
    %3 = vector.load %arg1[%c0_5, %c0_6, %c0_7] : memref<2x64x48xf32, #tpu.memory_space<vmem>>, vector<2x64x48xf32>
    %cst = arith.constant dense<0.000000e+00> : vector<2x48xf32>
    %4 = vector.multi_reduction <add>, %3, %cst [1] : vector<2x64x48xf32> to vector<2x48xf32>
    %cst_8 = arith.constant 1.562500e-02 : f32
    %5 = vector.broadcast %cst_8 : f32 to vector<2x48xf32>
    %6 = arith.mulf %4, %5 : vector<2x48xf32>
    %cst_9 = arith.constant dense<0.000000e+00> : vector<2x128xf32>
    %7 = tpu.matmul %6, %0, %cst_9 {dimension_numbers = #tpu.dot_dimension_numbers<[1], [0], [0], [1], [0, 0, 1, 1], [], []>} : vector<2x48xf32>, vector<48x128xf32>, vector<2x128xf32> -> vector<2x128xf32>
    %8 = vector.broadcast %1 : vector<1x128xf32> to vector<2x128xf32>
    %9 = arith.addf %7, %8 : vector<2x128xf32>
    %10 = arith.mulf %9, %9 : vector<2x128xf32>
    %cst_10 = arith.constant dense<0.000000e+00> : vector<2xf32>
    %11 = vector.multi_reduction <add>, %10, %cst_10 [1] : vector<2x128xf32> to vector<2xf32>
    %12 = vector.shape_cast %11 : vector<2xf32> to vector<2x1xf32>
    %13 = math.rsqrt %12 : vector<2x1xf32>
    %14 = vector.broadcast %13 : vector<2x1xf32> to vector<2x128xf32>
    %15 = arith.mulf %9, %14 : vector<2x128xf32>
    %c0_11 = arith.constant 0 : index
    %c0_12 = arith.constant 0 : index
    %c0_13 = arith.constant 0 : index
    %16 = vector.load %arg2[%c0_11, %c0_12, %c0_13] : memref<2x64x48xf32, #tpu.memory_space<vmem>>, vector<2x64x48xf32>
    %cst_14 = arith.constant dense<0.000000e+00> : vector<2x48xf32>
    %17 = vector.multi_reduction <add>, %16, %cst_14 [1] : vector<2x64x48xf32> to vector<2x48xf32>
    %cst_15 = arith.constant 1.562500e-02 : f32
    %18 = vector.broadcast %cst_15 : f32 to vector<2x48xf32>
    %19 = arith.mulf %17, %18 : vector<2x48xf32>
    %cst_16 = arith.constant dense<0.000000e+00> : vector<2x128xf32>
    %20 = tpu.matmul %19, %0, %cst_16 {dimension_numbers = #tpu.dot_dimension_numbers<[1], [0], [0], [1], [0, 0, 1, 1], [], []>} : vector<2x48xf32>, vector<48x128xf32>, vector<2x128xf32> -> vector<2x128xf32>
    %21 = vector.broadcast %1 : vector<1x128xf32> to vector<2x128xf32>
    %22 = arith.addf %20, %21 : vector<2x128xf32>
    %23 = arith.mulf %22, %22 : vector<2x128xf32>
    %cst_17 = arith.constant dense<0.000000e+00> : vector<2xf32>
    %24 = vector.multi_reduction <add>, %23, %cst_17 [1] : vector<2x128xf32> to vector<2xf32>
    %25 = vector.shape_cast %24 : vector<2xf32> to vector<2x1xf32>
    %26 = math.rsqrt %25 : vector<2x1xf32>
    %27 = vector.broadcast %26 : vector<2x1xf32> to vector<2x128xf32>
    %28 = arith.mulf %22, %27 : vector<2x128xf32>
    %c0_18 = arith.constant 0 : index
    %c0_19 = arith.constant 0 : index
    %29 = vector.load %arg3[%c0_18, %c0_19] : memref<2x64xf32, #tpu.memory_space<vmem>>, vector<2x64xf32>
    %cst_20 = arith.constant dense<0.000000e+00> : vector<2x128xf32>
    %30 = tpu.matmul %29, %2, %cst_20 {dimension_numbers = #tpu.dot_dimension_numbers<[1], [0], [0], [1], [0, 0, 1, 1], [], []>} : vector<2x64xf32>, vector<64x128xf32>, vector<2x128xf32> -> vector<2x128xf32>
    %31 = arith.mulf %30, %30 : vector<2x128xf32>
    %cst_21 = arith.constant dense<0.000000e+00> : vector<2xf32>
    %32 = vector.multi_reduction <add>, %31, %cst_21 [1] : vector<2x128xf32> to vector<2xf32>
    %33 = vector.shape_cast %32 : vector<2xf32> to vector<2x1xf32>
    %34 = math.rsqrt %33 : vector<2x1xf32>
    %35 = vector.broadcast %34 : vector<2x1xf32> to vector<2x128xf32>
    %36 = arith.mulf %30, %35 : vector<2x128xf32>
    %c0_22 = arith.constant 0 : index
    %c0_23 = arith.constant 0 : index
    %37 = vector.load %arg4[%c0_22, %c0_23] : memref<2x64xf32, #tpu.memory_space<vmem>>, vector<2x64xf32>
    %cst_24 = arith.constant dense<0.000000e+00> : vector<2x128xf32>
    %38 = tpu.matmul %37, %2, %cst_24 {dimension_numbers = #tpu.dot_dimension_numbers<[1], [0], [0], [1], [0, 0, 1, 1], [], []>} : vector<2x64xf32>, vector<64x128xf32>, vector<2x128xf32> -> vector<2x128xf32>
    %39 = arith.mulf %38, %38 : vector<2x128xf32>
    %cst_25 = arith.constant dense<0.000000e+00> : vector<2xf32>
    %40 = vector.multi_reduction <add>, %39, %cst_25 [1] : vector<2x128xf32> to vector<2xf32>
    %41 = vector.shape_cast %40 : vector<2xf32> to vector<2x1xf32>
    %42 = math.rsqrt %41 : vector<2x1xf32>
    %43 = vector.broadcast %42 : vector<2x1xf32> to vector<2x128xf32>
    %44 = arith.mulf %38, %43 : vector<2x128xf32>
    %45 = arith.mulf %15, %15 : vector<2x128xf32>
    %cst_26 = arith.constant dense<0.000000e+00> : vector<2xf32>
    %46 = vector.multi_reduction <add>, %45, %cst_26 [1] : vector<2x128xf32> to vector<2xf32>
    %47 = vector.shape_cast %46 : vector<2xf32> to vector<2x1xf32>
    %cst_27 = arith.constant 1.000000e-16 : f32
    %48 = vector.broadcast %cst_27 : f32 to vector<2x1xf32>
    %49 = arith.maximumf %47, %48 : vector<2x1xf32>
    %50 = math.rsqrt %49 : vector<2x1xf32>
    %51 = arith.mulf %36, %36 : vector<2x128xf32>
    %cst_28 = arith.constant dense<0.000000e+00> : vector<2xf32>
    %52 = vector.multi_reduction <add>, %51, %cst_28 [1] : vector<2x128xf32> to vector<2xf32>
    %53 = vector.shape_cast %52 : vector<2xf32> to vector<2x1xf32>
    %cst_29 = arith.constant 1.000000e-16 : f32
    %54 = vector.broadcast %cst_29 : f32 to vector<2x1xf32>
    %55 = arith.maximumf %53, %54 : vector<2x1xf32>
    %56 = math.rsqrt %55 : vector<2x1xf32>
    %57 = arith.mulf %15, %36 : vector<2x128xf32>
    %cst_30 = arith.constant dense<0.000000e+00> : vector<2xf32>
    %58 = vector.multi_reduction <add>, %57, %cst_30 [1] : vector<2x128xf32> to vector<2xf32>
    %59 = vector.shape_cast %58 : vector<2xf32> to vector<2x1xf32>
    %60 = arith.mulf %59, %50 : vector<2x1xf32>
    %61 = arith.mulf %60, %56 : vector<2x1xf32>
    %62 = arith.mulf %28, %28 : vector<2x128xf32>
    %cst_31 = arith.constant dense<0.000000e+00> : vector<2xf32>
    %63 = vector.multi_reduction <add>, %62, %cst_31 [1] : vector<2x128xf32> to vector<2xf32>
    %64 = vector.shape_cast %63 : vector<2xf32> to vector<2x1xf32>
    %cst_32 = arith.constant 1.000000e-16 : f32
    %65 = vector.broadcast %cst_32 : f32 to vector<2x1xf32>
    %66 = arith.maximumf %64, %65 : vector<2x1xf32>
    %67 = math.rsqrt %66 : vector<2x1xf32>
    %68 = arith.mulf %44, %44 : vector<2x128xf32>
    %cst_33 = arith.constant dense<0.000000e+00> : vector<2xf32>
    %69 = vector.multi_reduction <add>, %68, %cst_33 [1] : vector<2x128xf32> to vector<2xf32>
    %70 = vector.shape_cast %69 : vector<2xf32> to vector<2x1xf32>
    %cst_34 = arith.constant 1.000000e-16 : f32
    %71 = vector.broadcast %cst_34 : f32 to vector<2x1xf32>
    %72 = arith.maximumf %70, %71 : vector<2x1xf32>
    %73 = math.rsqrt %72 : vector<2x1xf32>
    %74 = arith.mulf %28, %44 : vector<2x128xf32>
    %cst_35 = arith.constant dense<0.000000e+00> : vector<2xf32>
    %75 = vector.multi_reduction <add>, %74, %cst_35 [1] : vector<2x128xf32> to vector<2xf32>
    %76 = vector.shape_cast %75 : vector<2xf32> to vector<2x1xf32>
    %77 = arith.mulf %76, %67 : vector<2x1xf32>
    %78 = arith.mulf %77, %73 : vector<2x1xf32>
    %79 = arith.subf %28, %15 : vector<2x128xf32>
    %80 = arith.subf %44, %36 : vector<2x128xf32>
    %81 = arith.mulf %79, %79 : vector<2x128xf32>
    %cst_36 = arith.constant dense<0.000000e+00> : vector<2xf32>
    %82 = vector.multi_reduction <add>, %81, %cst_36 [1] : vector<2x128xf32> to vector<2xf32>
    %83 = vector.shape_cast %82 : vector<2xf32> to vector<2x1xf32>
    %cst_37 = arith.constant 1.000000e-16 : f32
    %84 = vector.broadcast %cst_37 : f32 to vector<2x1xf32>
    %85 = arith.maximumf %83, %84 : vector<2x1xf32>
    %86 = math.rsqrt %85 : vector<2x1xf32>
    %87 = arith.mulf %80, %80 : vector<2x128xf32>
    %cst_38 = arith.constant dense<0.000000e+00> : vector<2xf32>
    %88 = vector.multi_reduction <add>, %87, %cst_38 [1] : vector<2x128xf32> to vector<2xf32>
    %89 = vector.shape_cast %88 : vector<2xf32> to vector<2x1xf32>
    %cst_39 = arith.constant 1.000000e-16 : f32
    %90 = vector.broadcast %cst_39 : f32 to vector<2x1xf32>
    %91 = arith.maximumf %89, %90 : vector<2x1xf32>
    %92 = math.rsqrt %91 : vector<2x1xf32>
    %93 = arith.mulf %79, %80 : vector<2x128xf32>
    %cst_40 = arith.constant dense<0.000000e+00> : vector<2xf32>
    %94 = vector.multi_reduction <add>, %93, %cst_40 [1] : vector<2x128xf32> to vector<2xf32>
    %95 = vector.shape_cast %94 : vector<2xf32> to vector<2x1xf32>
    %96 = arith.mulf %95, %86 : vector<2x1xf32>
    %97 = arith.mulf %96, %92 : vector<2x1xf32>
    %98 = arith.mulf %15, %15 : vector<2x128xf32>
    %cst_41 = arith.constant dense<0.000000e+00> : vector<2xf32>
    %99 = vector.multi_reduction <add>, %98, %cst_41 [1] : vector<2x128xf32> to vector<2xf32>
    %100 = vector.shape_cast %99 : vector<2xf32> to vector<2x1xf32>
    %cst_42 = arith.constant 1.000000e-16 : f32
    %101 = vector.broadcast %cst_42 : f32 to vector<2x1xf32>
    %102 = arith.maximumf %100, %101 : vector<2x1xf32>
    %103 = math.rsqrt %102 : vector<2x1xf32>
    %104 = arith.mulf %28, %28 : vector<2x128xf32>
    %cst_43 = arith.constant dense<0.000000e+00> : vector<2xf32>
    %105 = vector.multi_reduction <add>, %104, %cst_43 [1] : vector<2x128xf32> to vector<2xf32>
    %106 = vector.shape_cast %105 : vector<2xf32> to vector<2x1xf32>
    %cst_44 = arith.constant 1.000000e-16 : f32
    %107 = vector.broadcast %cst_44 : f32 to vector<2x1xf32>
    %108 = arith.maximumf %106, %107 : vector<2x1xf32>
    %109 = math.rsqrt %108 : vector<2x1xf32>
    %110 = arith.mulf %15, %28 : vector<2x128xf32>
    %cst_45 = arith.constant dense<0.000000e+00> : vector<2xf32>
    %111 = vector.multi_reduction <add>, %110, %cst_45 [1] : vector<2x128xf32> to vector<2xf32>
    %112 = vector.shape_cast %111 : vector<2xf32> to vector<2x1xf32>
    %113 = arith.mulf %112, %103 : vector<2x1xf32>
    %114 = arith.mulf %113, %109 : vector<2x1xf32>
    %115 = tpu.iota {dimensions = array<i32: 1>} : vector<2x128xi32>
    %c0_i32 = arith.constant 0 : i32
    %116 = vector.broadcast %c0_i32 : i32 to vector<2x128xi32>
    %117 = arith.cmpi eq, %115, %116 : vector<2x128xi32>
    %118 = arith.extui %117 : vector<2x128xi1> to vector<2x128xi32>
    %119 = arith.sitofp %118 : vector<2x128xi32> to vector<2x128xf32>
    %120 = vector.broadcast %61 : vector<2x1xf32> to vector<2x128xf32>
    %121 = arith.mulf %120, %119 : vector<2x128xf32>
    %c1_i32 = arith.constant 1 : i32
    %122 = vector.broadcast %c1_i32 : i32 to vector<2x128xi32>
    %123 = arith.cmpi eq, %115, %122 : vector<2x128xi32>
    %124 = arith.extui %123 : vector<2x128xi1> to vector<2x128xi32>
    %125 = arith.sitofp %124 : vector<2x128xi32> to vector<2x128xf32>
    %126 = vector.broadcast %78 : vector<2x1xf32> to vector<2x128xf32>
    %127 = arith.mulf %126, %125 : vector<2x128xf32>
    %128 = arith.addf %121, %127 : vector<2x128xf32>
    %c2_i32 = arith.constant 2 : i32
    %129 = vector.broadcast %c2_i32 : i32 to vector<2x128xi32>
    %130 = arith.cmpi eq, %115, %129 : vector<2x128xi32>
    %131 = arith.extui %130 : vector<2x128xi1> to vector<2x128xi32>
    %132 = arith.sitofp %131 : vector<2x128xi32> to vector<2x128xf32>
    %133 = vector.broadcast %97 : vector<2x1xf32> to vector<2x128xf32>
    %134 = arith.mulf %133, %132 : vector<2x128xf32>
    %135 = arith.addf %128, %134 : vector<2x128xf32>
    %c3_i32 = arith.constant 3 : i32
    %136 = vector.broadcast %c3_i32 : i32 to vector<2x128xi32>
    %137 = arith.cmpi eq, %115, %136 : vector<2x128xi32>
    %138 = arith.extui %137 : vector<2x128xi1> to vector<2x128xi32>
    %139 = arith.sitofp %138 : vector<2x128xi32> to vector<2x128xf32>
    %140 = vector.broadcast %114 : vector<2x1xf32> to vector<2x128xf32>
    %141 = arith.mulf %140, %139 : vector<2x128xf32>
    %142 = arith.addf %135, %141 : vector<2x128xf32>
    %c0_46 = arith.constant 0 : index
    %c0_47 = arith.constant 0 : index
    %143 = vector.load %arg8[%c0_46, %c0_47] : memref<2x128xf32, #tpu.memory_space<vmem>>, vector<2x128xf32>
    tpu.vector_store %arg8[%c0_46, %c0_47], %142 {strides = array<i32>} : memref<2x128xf32, #tpu.memory_space<vmem>>, vector<2x128xf32>,
    return
  }
  func.func @transform_0(%arg0: i32) -> (i32, i32, i32) {
    %c0_i32 = arith.constant 0 : i32
    %c0_i32_0 = arith.constant 0 : i32
    %c0_i32_1 = arith.constant 0 : i32
    return %arg0, %c0_i32, %c0_i32_0 : i32, i32, i32
  }
  func.func @transform_1(%arg0: i32) -> (i32, i32, i32) {
    %c0_i32 = arith.constant 0 : i32
    %c0_i32_0 = arith.constant 0 : i32
    %c0_i32_1 = arith.constant 0 : i32
    return %arg0, %c0_i32, %c0_i32_0 : i32, i32, i32
  }
  func.func @transform_2(%arg0: i32) -> (i32, i32) {
    %c0_i32 = arith.constant 0 : i32
    %c0_i32_0 = arith.constant 0 : i32
    return %arg0, %c0_i32 : i32, i32
  }
  func.func @transform_3(%arg0: i32) -> (i32, i32) {
    %c0_i32 = arith.constant 0 : i32
    %c0_i32_0 = arith.constant 0 : i32
    return %arg0, %c0_i32 : i32, i32
  }
  func.func @transform_4(%arg0: i32) -> (i32, i32) {
    %c0_i32 = arith.constant 0 : i32
    %c0_i32_0 = arith.constant 0 : i32
    %c0_i32_1 = arith.constant 0 : i32
    return %c0_i32, %c0_i32_0 : i32, i32
  }
  func.func @transform_5(%arg0: i32) -> (i32, i32) {
    %c0_i32 = arith.constant 0 : i32
    %c0_i32_0 = arith.constant 0 : i32
    %c0_i32_1 = arith.constant 0 : i32
    return %c0_i32, %c0_i32_0 : i32, i32
  }
  func.func @transform_6(%arg0: i32) -> (i32, i32) {
    %c0_i32 = arith.constant 0 : i32
    %c0_i32_0 = arith.constant 0 : i32
    %c0_i32_1 = arith.constant 0 : i32
    return %c0_i32, %c0_i32_0 : i32, i32
  }
  func.func @transform_7(%arg0: i32) -> (i32, i32) {
    %c0_i32 = arith.constant 0 : i32
    %c0_i32_0 = arith.constant 0 : i32
    return %arg0, %c0_i32 : i32, i32
  }
}

</mosaic_0001>

<bundles_post_ra>
// kernel: forward.1
= control target key start
LH: loop header
LB: loop body
LE: loop exit
PB: predicated region body
PF: predicated region fallthrough
CT: control target
= control target key end

     0   :  { %v755_v0 = vmov 0.0|0.0   ;;  %vm57_vm0 = vcmask 392192   ;;  %vm756_vm1 = vmmov 0   ;;  %v757_v6 = vmov 0.0   ;;  %s1024_s4 = inlined_call_operand.vmem [shape: f32[48,128], index: 4, kind: input, shape index: {}]   ;;  %s1025_s0 = inlined_call_operand.vmem [shape: f32[2,64,48], index: 0, kind: input, shape index: {}]   ;;  %s1026_s1 = inlined_call_operand.vmem [shape: f32[2,64,48], index: 1, kind: input, shape index: {}]   ;;  %s1027_s6 = inlined_call_operand.vmem [shape: f32[64,128], index: 6, kind: input, shape index: {}]   ;;  %s1028_s2 = inlined_call_operand.vmem [shape: f32[2,64], index: 2, kind: input, shape index: {}]   ;;  %s1029_s3 = inlined_call_operand.vmem [shape: f32[2,64], index: 3, kind: input, shape index: {}]   ;;  %s1030_s5 = inlined_call_operand.vmem [shape: f32[1,128], index: 5, kind: input, shape index: {}]   ;;  %s1031_s7 = inlined_call_operand.vmem [shape: f32[2,128], index: 7, kind: output, shape index: {}]  }
   0x1   :  { %690 = vmatprep.subr.bf16.mxu0 %v755_v0  ;;  %v26_v1 = vld [vmem:[%s1024_s4] sm:$0xff]  ;;  %v27_v2 = vld [vmem:[%s1024_s4 + $0x8] sm:$0xff]  ;;  %699 = vmatprep.subr.bf16.mxu1 %v755_v0  ;;  %v28_v3 = vld [vmem:[%s1024_s4 + $0x10] sm:$0xff]  ;;  %vm110_vm2 = vcmask 1041409   ;;  %vm333_vm3 = vcmask 523264   ;;  %vm185_vm4 = vcmask 1041408  }
   0x2   :  { %v691_v4 = vpack.c.bf16 %v27_v2, %v26_v1  ;;  %v29_v5 = vld [vmem:[%s1024_s4 + $0x18] sm:$0xff]  ;;  %634 = vmatprep.mubr.msk.f32.mxu0 %vm756_vm1, %v757_v6  ;;  %649 = vmatprep.mubr.msk.f32.mxu1 %vm756_vm1, %v757_v6  ;;  %v41_v7 = vld [vmem:[%s1025_s0] sm:$0xff]  ;;  %v42_v8 = vld [vmem:[%s1025_s0 + $0x8] sm:$0xff] }
   0x3   :  { %v43_v9 = vld [vmem:[%s1025_s0 + $0x10] sm:$0xff]  ;;  %v694_v10 = vpack.c.bf16 %v29_v5, %v28_v3  ;;  %v30_v11 = vld [vmem:[%s1024_s4 + $0x20] sm:$0xff]  ;;  %v31_v12 = vld [vmem:[%s1024_s4 + $0x28] sm:$0xff]  ;;  %v58_v14 = vsel %vm57_vm0, %v41_v7, 0.0  ;;  %v59_v15 = vsel %vm57_vm0, %v42_v8, 0.0 }
   0x4   :  { %692 = vmatpush3.bf16.msra.mxu0 %v691_v4  ;;  %701 = vmatpush3.bf16.msra.mxu1 %v691_v4  ;;  %v44_v13 = vld [vmem:[%s1025_s0 + $0x18] sm:$0xff]  ;;  %v61_v16 = vsel %vm57_vm0, %v43_v9, 0.0  ;;  %v45_v17 = vld [vmem:[%s1025_s0 + $0x20] sm:$0xff]  ;;  %v46_v18 = vld [vmem:[%s1025_s0 + $0x28] sm:$0xff]  ;;  %v60_v20 = vadd.f32 %v59_v15, %v58_v14  ;;  %v697_v30 = vpack.c.bf16 %v31_v12, %v30_v11 }
   0x5   :  { %693 = vmatprep.subr.bf16.mxu0 %v755_v0  ;;  %702 = vmatprep.subr.bf16.mxu1 %v755_v0  ;;  %v49_v19 = vld [vmem:[%s1025_s0 + $0x40] sm:$0xff]  ;;  %v50_v21 = vld [vmem:[%s1025_s0 + $0x48] sm:$0xff]  ;;  %v51_v22 = vld [vmem:[%s1025_s0 + $0x50] sm:$0xff]  ;;  %v63_v24 = vsel %vm57_vm0, %v44_v13, 0.0  ;;  %v65_v34 = vsel %vm57_vm0, %v45_v17, 0.0  ;;  %v67_v37 = vsel %vm57_vm0, %v46_v18, 0.0 }
   0x6   :  { %v52_v23 = vld [vmem:[%s1025_s0 + $0x58] sm:$0xff]  ;;  %v79_v25 = vsel %vm57_vm0, %v49_v19, 0.0  ;;  %v47_v26 = vld [vmem:[%s1025_s0 + $0x30] sm:$0xff]  ;;  %v62_v27 = vadd.f32 %v61_v16, %v60_v20  ;;  %v80_v28 = vsel %vm57_vm0, %v50_v21, 0.0  ;;  %v82_v29 = vsel %vm57_vm0, %v51_v22, 0.0  ;;  %v53_v32 = vld [vmem:[%s1025_s0 + $0x60] sm:$0xff] }
   0x7   :  { %v48_v31 = vld [vmem:[%s1025_s0 + $0x38] sm:$0xff]  ;;  %v54_v33 = vld [vmem:[%s1025_s0 + $0x68] sm:$0xff]  ;;  %v81_v35 = vadd.f32 %v80_v28, %v79_v25  ;;  %v84_v38 = vsel %vm57_vm0, %v52_v23, 0.0  ;;  %v191_v39 = vld [vmem:[%s1026_s1] sm:$0xff]  ;;  %v69_v49 = vsel %vm57_vm0, %v47_v26, 0.0  ;;  %v86_v50 = vsel %vm57_vm0, %v53_v32, 0.0 }
   0x8   :  { %695 = vmatpush3.bf16.msra.mxu0 %v694_v10  ;;  %704 = vmatpush3.bf16.msra.mxu1 %v694_v10  ;;  %v64_v36 = vadd.f32 %v63_v24, %v62_v27  ;;  %v192_v40 = vld [vmem:[%s1026_s1 + $0x8] sm:$0xff]  ;;  %v193_v41 = vld [vmem:[%s1026_s1 + $0x10] sm:$0xff]  ;;  %v194_v43 = vld [vmem:[%s1026_s1 + $0x18] sm:$0xff]  ;;  %v207_v44 = vsel %vm57_vm0, %v191_v39, 0.0  ;;  %v71_v54 = vsel %vm57_vm0, %v48_v31, 0.0  ;;  %v88_v56 = vsel %vm57_vm0, %v54_v33, 0.0 }
   0x9   :  { %696 = vmatprep.subr.bf16.mxu0 %v755_v0  ;;  %705 = vmatprep.subr.bf16.mxu1 %v755_v0  ;;  %v83_v42 = vadd.f32 %v82_v29, %v81_v35  ;;  %v208_v45 = vsel %vm57_vm0, %v192_v40, 0.0  ;;  %v210_v46 = vsel %vm57_vm0, %v193_v41, 0.0  ;;  %v55_v47 = vld [vmem:[%s1025_s0 + $0x70] sm:$0xff]  ;;  %v195_v51 = vld [vmem:[%s1026_s1 + $0x20] sm:$0xff]  ;;  %v200_v57 = vld [vmem:[%s1026_s1 + $0x48] sm:$0xff]  ;;  %v212_v60 = vsel %vm57_vm0, %v194_v43, 0.0 }
   0xa   :  { %v66_v48 = vadd.f32 %v65_v34, %v64_v36  ;;  %v199_v52 = vld [vmem:[%s1026_s1 + $0x40] sm:$0xff]  ;;  %v209_v53 = vadd.f32 %v208_v45, %v207_v44  ;;  %v201_v58 = vld [vmem:[%s1026_s1 + $0x50] sm:$0xff]  ;;  %v202_v59 = vld [vmem:[%s1026_s1 + $0x58] sm:$0xff]  ;;  %v229_v2 = vsel %vm57_vm0, %v200_v57, 0.0  ;;  %v214_v7 = vsel %vm57_vm0, %v195_v51, 0.0 }
   0xb   :  { %v85_v55 = vadd.f32 %v84_v38, %v83_v42  ;;  %v196_v62 = vld [vmem:[%s1026_s1 + $0x28] sm:$0xff]  ;;  %v228_v1 = vsel %vm57_vm0, %v199_v52, 0.0  ;;  %v56_v3 = vld [vmem:[%s1025_s0 + $0x78] sm:$0xff]  ;;  %v203_v5 = vld [vmem:[%s1026_s1 + $0x60] sm:$0xff]  ;;  %v231_v9 = vsel %vm57_vm0, %v201_v58, 0.0  ;;  %v90_v11 = vsel %vm57_vm0, %v55_v47, 0.0 }
   0xc   :  { %698 = vmatpush3.bf16.msra.mxu0 %v697_v30  ;;  %707 = vmatpush3.bf16.msra.mxu1 %v697_v30  ;;  %v68_v61 = vadd.f32 %v67_v37, %v66_v48  ;;  %v211_v63 = vadd.f32 %v210_v46, %v209_v53  ;;  %v230_v8 = vadd.f32 %v229_v2, %v228_v1  ;;  %v197_v12 = vld [vmem:[%s1026_s1 + $0x30] sm:$0xff]  ;;  %v233_v14 = vsel %vm57_vm0, %v202_v59, 0.0  ;;  %v204_v16 = vld [vmem:[%s1026_s1 + $0x68] sm:$0xff]  ;;  %v198_v21 = vld [vmem:[%s1026_s1 + $0x38] sm:$0xff] }
   0xd   :  { %708 = vmatprep.subr.bf16.mxu0 %v755_v0  ;;  %720 = vmatprep.subr.bf16.mxu1 %v755_v0  ;;  %v87_v4 = vadd.f32 %v86_v50, %v85_v55  ;;  %v216_v17 = vsel %vm57_vm0, %v196_v62, 0.0  ;;  %v92_v20 = vsel %vm57_vm0, %v56_v3, 0.0  ;;  %v235_v23 = vsel %vm57_vm0, %v203_v5, 0.0  ;;  %v205_v25 = vld [vmem:[%s1026_s1 + $0x70] sm:$0xff]  ;;  %v206_v32 = vld [vmem:[%s1026_s1 + $0x78] sm:$0xff]  ;;  %v33_v57 = vld [vmem:[%s1027_s6] sm:$0xff] }
   0xe   :  { %v70_v10 = vadd.f32 %v69_v49, %v68_v61  ;;  %v213_v13 = vadd.f32 %v212_v60, %v211_v63  ;;  %v232_v18 = vadd.f32 %v231_v9, %v230_v8  ;;  %v218_v26 = vsel %vm57_vm0, %v197_v12, 0.0  ;;  %v34_v58 = vld [vmem:[%s1027_s6 + $0x8] sm:$0xff]  ;;  %v35_v5 = vld [vmem:[%s1027_s6 + $0x10] sm:$0xff] }
   0xf   :  { %v89_v15 = vadd.f32 %v88_v56, %v87_v4  ;;  %v237_v30 = vsel %vm57_vm0, %v204_v16, 0.0  ;;  %v220_v33 = vsel %vm57_vm0, %v198_v21, 0.0  ;;  %v239_v37 = vsel %vm57_vm0, %v205_v25, 0.0  ;;  %v332_v21 = vld [vmem:[%s1028_s2] sm:$0x3] }
  0x10   :  { %v72_v19 = vadd.f32 %v71_v54, %v70_v10  ;;  %v215_v22 = vadd.f32 %v214_v7, %v213_v13  ;;  %v234_v27 = vadd.f32 %v233_v14, %v232_v18  ;;  %v241_v42 = vsel %vm57_vm0, %v206_v32, 0.0  ;;  %v36_v7 = vld [vmem:[%s1027_s6 + $0x18] sm:$0xff]  ;;  %v37_v13 = vld [vmem:[%s1027_s6 + $0x20] sm:$0xff]  ;;  %v38_v14 = vld [vmem:[%s1027_s6 + $0x28] sm:$0xff] }
  0x11   :  { %v91_v24 = vadd.f32 %v90_v11, %v89_v15  ;;  %v709_v2 = vpack.c.bf16 %v34_v58, %v33_v57  ;;  %v712_v12 = vpack.c.bf16 %v36_v7, %v35_v5  ;;  %v39_v18 = vld [vmem:[%s1027_s6 + $0x30] sm:$0xff] }
  0x12   :  { %v73_v28 = vrot.slane %v72_v19, 4  ;;  %v217_v29 = vadd.f32 %v216_v17, %v215_v22  ;;  %v236_v34 = vadd.f32 %v235_v23, %v234_v27  ;;  %v715_v17 = vpack.c.bf16 %v38_v14, %v37_v13  ;;  %v413_v22 = vld [vmem:[%s1029_s3] sm:$0x3] }
  0x13   :  { %v93_v31 = vadd.f32 %v92_v20, %v91_v24  ;;  %v581_v23 = vld [vmem:[%s1030_s5] ss:$0 sm:$0xff] }
  0x14   :  { %v74_v35 = vadd.f32 %v73_v28, %v72_v19  ;;  %v219_v36 = vadd.f32 %v218_v26, %v217_v29  ;;  %v238_v39 = vadd.f32 %v237_v30, %v236_v34  ;;  %v40_v19 = vld [vmem:[%s1027_s6 + $0x38] sm:$0xff] }
  0x15   :  { %v94_v38 = vrot.slane %v93_v31, 4  ;;  %v718_v20 = vpack.c.bf16 %v40_v19, %v39_v18 }
  0x16   :  { %v75_v40 = vrot.slane %v74_v35, 2  ;;  %v221_v41 = vadd.f32 %v220_v33, %v219_v36  ;;  %v240_v44 = vadd.f32 %v239_v37, %v238_v39 }
  0x17   :  { %v95_v43 = vadd.f32 %v94_v38, %v93_v31 }
  0x18   :  { %v76_v45 = vadd.f32 %v75_v40, %v74_v35  ;;  %v222_v46 = vrot.slane %v221_v41, 4  ;;  %v242_v48 = vadd.f32 %v241_v42, %v240_v44 }
  0x19   :  { %v96_v47 = vrot.slane %v95_v43, 2 }
  0x1a   :  { %v77_v49 = vrot.slane %v76_v45, 1  ;;  %v223_v50 = vadd.f32 %v222_v46, %v221_v41  ;;  %v243_v52 = vrot.slane %v242_v48, 4 }
  0x1b   :  { %v97_v51 = vadd.f32 %v96_v47, %v95_v43 }
  0x1c   :  { %v78_v53 = vadd.f32 %v77_v49, %v76_v45  ;;  %v224_v54 = vrot.slane %v223_v50, 2  ;;  %v244_v56 = vadd.f32 %v243_v52, %v242_v48 }
  0x1d   :  { %v98_v55 = vrot.slane %v97_v51, 1 }
  0x1e   :  { %v225_v59 = vadd.f32 %v224_v54, %v223_v50  ;;  %v100_v61 = vmul.f32 0.015625, %v78_v53  ;;  %v245_v62 = vrot.slane %v244_v56, 2 }
  0x1f   :  { %v99_v60 = vadd.f32 %v98_v55, %v97_v51 }
  0x20   :  { %v226_v63 = vrot.slane %v225_v59, 1  ;;  %v246_v3 = vadd.f32 %v245_v62, %v244_v56 }
  0x21   :  { %v101_v1 = vmul.f32 0.015625, %v99_v60 }
  0x22   :  { %v227_v4 = vadd.f32 %v226_v63, %v225_v59  ;;  %v247_v9 = vrot.slane %v246_v3, 1 }
  0x23   :  { %v111_v8 = vsel %vm110_vm2, %v101_v1, %v100_v61 }
  0x24   :  { %635 = vmatmul.mubr.msk.f32.vlgmr.msra.gmra.mrb[0].mxu0 %vm57_vm0, %v111_v8  ;;  %v248_v10 = vadd.f32 %v247_v9, %v246_v3  ;;  %v249_v11 = vmul.f32 0.015625, %v227_v4 }
  0x25   :  { %710 = vmatpush3.bf16.msra.mxu0 %v709_v2  ;;  %668 = vmatprep.mubr.msk.f32.mxu0 %vm756_vm1, %v757_v6 }
  0x26   :  { %711 = vmatprep.subr.bf16.mxu0 %v755_v0  ;;  %v250_v15 = vmul.f32 0.015625, %v248_v10 }
  0x28   :  { %v253_v16 = vsel %vm110_vm2, %v250_v15, %v249_v11 }
  0x29   :  { %713 = vmatpush3.bf16.msra.mxu0 %v712_v12  ;;  %650 = vmatmul.mubr.msk.f32.vlgmr.msra.gmra.mrb[0].mxu1 %vm57_vm0, %v253_v16 }
  0x2a   :  { %714 = vmatprep.subr.bf16.mxu0 %v755_v0  ;;  %722 = vmatpush3.bf16.msra.mxu1 %v709_v2 }
  0x2b   :  { %687 = vmatprep.mubr.msk.f32.mxu1 %vm756_vm1, %v757_v6  ;;  %723 = vmatprep.subr.bf16.mxu1 %v755_v0 }
  0x2d   :  { %716 = vmatpush3.bf16.msra.mxu0 %v715_v17 }
  0x2e   :  { %717 = vmatprep.subr.bf16.mxu0 %v755_v0  ;;  %725 = vmatpush3.bf16.msra.mxu1 %v712_v12 }
  0x2f   :  { %726 = vmatprep.subr.bf16.mxu1 %v755_v0 }
  0x31   :  { %719 = vmatpush3.bf16.msra.mxu0 %v718_v20 }
  0x32   :  { %728 = vmatpush3.bf16.msra.mxu1 %v715_v17 }
  0x33   :  { %729 = vmatprep.subr.bf16.mxu1 %v755_v0 }
  0x34   :  { %669 = vmatmul.mubr.msk.f32.vlgmr.msra.gmra.mrb[2].mxu0 %vm333_vm3, %v332_v21 }
  0x36   :  { %731 = vmatpush3.bf16.msra.mxu1 %v718_v20 }
  0x39   :  { %688 = vmatmul.mubr.msk.f32.vlgmr.msra.gmra.mrb[2].mxu1 %vm333_vm3, %v413_v22 }
  0xf7   :  { %v180_v24 = vpop.f32.mrb[0].mxu0 }
  0xf8   :  { %v181_v25 = vadd.f32 %v581_v23, %v180_v24  ;;  %v636_v26 = vpop.f32.mrb[1].mxu0 }
  0xfa   :  { %v184_v27 = vmul.f32 %v181_v25, %v181_v25 }
  0xfc   :  { %v186_v28 = vsel %vm185_vm4, %v184_v27, 0.0  ;;  %v322_v29 = vpop.f32.mrb[0].mxu1 }
  0xfd   :  { %187 = vadd.xlane.f32.xlu0 %v186_v28  ;;  %v323_v0 = vadd.f32 %v581_v23, %v322_v29  ;;  %v651_v30 = vpop.f32.mrb[1].mxu1  ;;  %v555_v23 = vlaneseq }
  0xff   :  { %v326_v31 = vmul.f32 %v323_v0, %v323_v0  ;;  %v556_v26 = vand.u32 127, %v555_v23 }
 0x101   :  { %v327_v32 = vsel %vm185_vm4, %v326_v31, 0.0  ;;  %vm561_vm5 = vcmp.eq.s32.totalorder %v556_v26, 1  ;;  %vm557_vm6 = vcmp.eq.s32.totalorder %v556_v26, 0  ;;  %vm566_vm7 = vcmp.eq.s32.totalorder %v556_v26, 2 }
 0x102   :  { %328 = vadd.xlane.f32.xlu0 %v327_v32  ;;  %vm571_vm8 = vcmp.eq.s32.totalorder %v556_v26, 3 }
 0x107   :  { %v403_v33 = vpop.f32.mrb[2].mxu0 }
 0x108   :  { %v670_v34 = vpop.f32.mrb[3].mxu0  ;;  %v407_v35 = vmul.f32 %v403_v33, %v403_v33 }
 0x10a   :  { %v408_v36 = vsel %vm185_vm4, %v407_v35, 0.0 }
 0x10b   :  { %409 = vadd.xlane.f32.xlu1 %v408_v36  ;;  %v587_v36 = vsel %vm561_vm5, 1.0, %v757_v6 }
 0x10c   :  { %v483_v37 = vpop.f32.mrb[2].mxu1 }
 0x10d   :  { %v487_v38 = vmul.f32 %v483_v37, %v483_v37  ;;  %v689_v39 = vpop.f32.mrb[3].mxu1 }
 0x10f   :  { %v488_v40 = vsel %vm185_vm4, %v487_v38, 0.0 }
 0x110   :  { %489 = vadd.xlane.f32.xlu1 %v488_v40  ;;  %v586_v40 = vsel %vm557_vm6, 1.0, %v757_v6 }
 0x18a   :  { %v188_v41 = vpop.xlane.xlu0 %187 }
 0x18b   :  { %735 = vrsqrt.f32 %v188_v41 }
 0x18f   :  { %v329_v42 = vpop.xlane.xlu0 %328 }
 0x190   :  { %737 = vrsqrt.f32 %v329_v42 }
 0x195   :  { %v736_v43 = vpop.eup %735 }
 0x196   :  { %v190_v44 = vmul.f32 %v736_v43, %v181_v25 }
 0x198   :  { %v410_v45 = vpop.xlane.xlu1 %409  ;;  %v493_v46 = vmul.f32 %v190_v44, %v190_v44 }
 0x199   :  { %739 = vrsqrt.f32 %v410_v45  ;;  %v588_v45 = vsel %vm566_vm7, 1.0, %v757_v6 }
 0x19a   :  { %v494_v47 = vsel %vm185_vm4, %v493_v46, 0.0  ;;  %v738_v48 = vpop.eup %737 }
 0x19b   :  { %495 = vadd.xlane.f32.xlu0 %v494_v47  ;;  %v331_v49 = vmul.f32 %v738_v48, %v323_v0 }
 0x19d   :  { %v490_v50 = vpop.xlane.xlu1 %489  ;;  %v511_v51 = vmul.f32 %v331_v49, %v331_v49  ;;  %v529_v55 = vsub.f32 %v331_v49, %v190_v44  ;;  %v549_v11 = vmul.f32 %v331_v49, %v190_v44 }
 0x19e   :  { %741 = vrsqrt.f32 %v490_v50 }
 0x19f   :  { %v512_v52 = vsel %vm185_vm4, %v511_v51, 0.0  ;;  %v531_v58 = vmul.f32 %v529_v55, %v529_v55  ;;  %v550_v12 = vsel %vm185_vm4, %v549_v11, 0.0 }
 0x1a0   :  { %513 = vadd.xlane.f32.xlu1 %v512_v52 }
 0x1a1   :  { %v532_v61 = vsel %vm185_vm4, %v531_v58, 0.0 }
 0x1a3   :  { %v740_v53 = vpop.eup %739 }
 0x1a4   :  { %v412_v54 = vmul.f32 %v740_v53, %v403_v33 }
 0x1a6   :  { %v499_v56 = vmul.f32 %v412_v54, %v412_v54  ;;  %v505_v63 = vmul.f32 %v412_v54, %v190_v44 }
 0x1a8   :  { %v500_v57 = vsel %vm185_vm4, %v499_v56, 0.0  ;;  %v742_v59 = vpop.eup %741  ;;  %v506_v4 = vsel %vm185_vm4, %v505_v63, 0.0 }
 0x1a9   :  { %501 = vadd.xlane.f32.xlu0 %v500_v57  ;;  %v492_v60 = vmul.f32 %v742_v59, %v483_v37 }
 0x1ab   :  { %v517_v62 = vmul.f32 %v492_v60, %v492_v60  ;;  %v530_v1 = vsub.f32 %v492_v60, %v412_v54  ;;  %v523_v8 = vmul.f32 %v492_v60, %v331_v49  ;;  %v589_v49 = vsel %vm571_vm8, 1.0, %v757_v6 }
 0x1ad   :  { %533 = vadd.xlane.f32.xlu0 %v532_v61  ;;  %v518_v2 = vsel %vm185_vm4, %v517_v62, 0.0  ;;  %v537_v3 = vmul.f32 %v530_v1, %v530_v1  ;;  %v543_v5 = vmul.f32 %v530_v1, %v529_v55  ;;  %v524_v10 = vsel %vm185_vm4, %v523_v8, 0.0 }
 0x1ae   :  { %519 = vadd.xlane.f32.xlu1 %v518_v2 }
 0x1af   :  { %v538_v7 = vsel %vm185_vm4, %v537_v3, 0.0  ;;  %v544_v9 = vsel %vm185_vm4, %v543_v5, 0.0 }
 0x1b1   :  { %507 = vadd.xlane.f32.xlu0 %v506_v4 }
 0x1b2   :  { %539 = vadd.xlane.f32.xlu1 %v538_v7 }
 0x1b5   :  { %545 = vadd.xlane.f32.xlu0 %v544_v9 }
 0x1b6   :  { %525 = vadd.xlane.f32.xlu1 %v524_v10 }
 0x1ba   :  { %551 = vadd.xlane.f32.xlu1 %v550_v12 }
 0x228   :  { %v496_v13 = vpop.xlane.xlu0 %495 }
 0x229   :  { %v497_v16 = vmax.f32 %v496_v13, 1e-16 }
 0x22b   :  { %743 = vrsqrt.f32 %v497_v16 }
 0x22d   :  { %v514_v14 = vpop.xlane.xlu1 %513 }
 0x22e   :  { %v515_v17 = vmax.f32 %v514_v14, 1e-16 }
 0x230   :  { %745 = vrsqrt.f32 %v515_v17 }
 0x235   :  { %v744_v28 = vpop.eup %743 }
 0x236   :  { %v502_v15 = vpop.xlane.xlu0 %501 }
 0x237   :  { %v503_v18 = vmax.f32 %v502_v15, 1e-16 }
 0x239   :  { %747 = vrsqrt.f32 %v503_v18 }
 0x23a   :  { %v534_v19 = vpop.xlane.xlu0 %533  ;;  %v746_v0 = vpop.eup %745 }
 0x23b   :  { %v535_v20 = vmax.f32 %v534_v19, 1e-16  ;;  %v520_v21 = vpop.xlane.xlu1 %519 }
 0x23c   :  { %v521_v22 = vmax.f32 %v520_v21, 1e-16 }
 0x23d   :  { %749 = vrsqrt.f32 %v535_v20 }
 0x23e   :  { %751 = vrsqrt.f32 %v521_v22  ;;  %v508_v29 = vpop.xlane.xlu0 %507 }
 0x23f   :  { %v540_v24 = vpop.xlane.xlu1 %539  ;;  %v509_v32 = vmul.f32 %v744_v28, %v508_v29 }
 0x240   :  { %v541_v25 = vmax.f32 %v540_v24, 1e-16 }
 0x242   :  { %753 = vrsqrt.f32 %v541_v25  ;;  %v546_v41 = vpop.xlane.xlu0 %545 }
 0x243   :  { %v526_v27 = vpop.xlane.xlu1 %525  ;;  %v748_v30 = vpop.eup %747 }
 0x244   :  { %v527_v33 = vmul.f32 %v746_v0, %v526_v27  ;;  %v510_v37 = vmul.f32 %v748_v30, %v509_v32 }
 0x246   :  { %v560_v46 = vmul.f32 %v586_v40, %v510_v37 }
 0x247   :  { %v750_v31 = vpop.eup %749  ;;  %v552_v34 = vpop.xlane.xlu1 %551 }
 0x248   :  { %v752_v35 = vpop.eup %751  ;;  %v553_v39 = vmul.f32 %v744_v28, %v552_v34  ;;  %v547_v42 = vmul.f32 %v750_v31, %v546_v41 }
 0x249   :  { %v528_v38 = vmul.f32 %v752_v35, %v527_v33 }
 0x24a   :  { %v554_v48 = vmul.f32 %v746_v0, %v553_v39 }
 0x24b   :  { %v564_v43 = vmul.f32 %v587_v36, %v528_v38 }
 0x24c   :  { %v754_v44 = vpop.eup %753  ;;  %v574_v53 = vmul.f32 %v589_v49, %v554_v48 }
 0x24d   :  { %v548_v47 = vmul.f32 %v754_v44, %v547_v42  ;;  %v565_v51 = vadd.f32 %v564_v43, %v560_v46 }
 0x24f   :  { %v569_v50 = vmul.f32 %v588_v45, %v548_v47 }
 0x251   :  { %v570_v52 = vadd.f32 %v569_v50, %v565_v51 }
 0x253   :  { %v575_v54 = vadd.f32 %v574_v53, %v570_v52 }
 0x255   :  { %576 = vst [vmem:[%s1031_s7] sm:$0x3] %v575_v54 }

</bundles_post_ra>
